<compile_context>
chip_gen: v7x
topology: tpu7x:2x2x1
jax: 0.10.0
libtpu: 0.0.40
codegen_flags: <defaults>
</compile_context>

<pallas_src>
import jax
import jax.numpy as jnp
from jax.experimental import pallas as pl
from jax.experimental.pallas import tpu as pltpu


def _logistic_kernel(w_ref, b_ref, x_ref, o_ref):
    # w_ref, b_ref: (1, 1) scalars in SMEM; x_ref / o_ref: (tile_rows, lane) VMEM tiles.
    w = w_ref[0, 0]
    b = b_ref[0, 0]
    z = x_ref[...] * w + b                 # Linear(1, 1): x @ W^T + b  ==  x * w + b
    o_ref[...] = 1.0 / (1.0 + jnp.exp(-z))  # sigmoid (f32, exact divide; hidden under DMA)


def _run_slab(x2d, w2d, b2d, tile_rows):
    """Run the elementwise logistic kernel over a lane-dense (rows, lane) slab."""
    rows, lane = x2d.shape
    n_elems = rows * lane
    return pl.pallas_call(
        _logistic_kernel,
        out_shape=jax.ShapeDtypeStruct((rows, lane), jnp.float32),
        grid_spec=pl.GridSpec(
            grid=(pl.cdiv(rows, tile_rows),),            # edge block masked by Pallas
            in_specs=[
                pl.BlockSpec(memory_space=pltpu.SMEM),              # weight (1, 1)
                pl.BlockSpec(memory_space=pltpu.SMEM),              # bias   (1, 1)
                pl.BlockSpec((tile_rows, lane), lambda i: (i, 0)),  # x tile
            ],
            out_specs=pl.BlockSpec((tile_rows, lane), lambda i: (i, 0)),
        ),
        compiler_params=pltpu.CompilerParams(
            dimension_semantics=("parallel",),           # megacore split on v7x
            vmem_limit_bytes=32 * 1024 * 1024,           # safe headroom on all gens
        ),
        cost_estimate=pl.CostEstimate(
            flops=3 * n_elems,                           # mul + add + add (denominator)
            transcendentals=n_elems,                     # exp
            bytes_accessed=8 * n_elems,                  # f32 in + f32 out
        ),
    )(w2d, b2d, x2d)


def logistic_forward(x, weight, bias, *, row_tile=1024, lane=512):
    """x: (..., 1) f32, weight: (1, 1) f32, bias: (1,) f32 -> sigmoid(x * w + b), same shape."""
    assert row_tile % 8 == 0 and lane % 128 == 0, "(8, 128) tiling rule"
    orig_shape = x.shape
    flat = x.reshape(-1).astype(jnp.float32)   # contiguous reshape + no-op cast: free
    n = int(flat.size)

    w2d = weight.reshape(1, 1).astype(jnp.float32)
    b2d = bias.reshape(1, 1).astype(jnp.float32)

    rows = n // lane
    tail = n - rows * lane

    parts = []
    if rows > 0:
        # Lane-dense view of the lane-aligned bulk.  Zero-copy when tail == 0
        # (the common case); otherwise only the aligned prefix is sliced.
        bulk = flat if tail == 0 else flat[: rows * lane]
        bulk2d = bulk.reshape(rows, lane)
        tile_rows = row_tile if rows >= row_tile else rows  # full-dims block for small inputs
        out2d = _run_slab(bulk2d, w2d, b2d, tile_rows)
        parts.append(out2d.reshape(-1))
    if tail > 0:
        # Remainder (< lane elements): pad only these few elements to one
        # lane-dense row and push them through the same kernel.
        t_lane = 128 * pl.cdiv(tail, 128)
        tail2d = jnp.pad(flat[rows * lane:], (0, t_lane - tail)).reshape(1, t_lane)
        tail_out = _run_slab(tail2d, w2d, b2d, 1)
        parts.append(tail_out.reshape(-1)[:tail])

    out = parts[0] if len(parts) == 1 else jnp.concatenate(parts)
    return out.reshape(orig_shape)


if __name__ == "__main__":
    key = jax.random.PRNGKey(0)
    kw, kb, k1, k2, k3 = jax.random.split(key, 5)

    # Parameters matching torch.nn.Linear(1, 1) shapes.
    weight = jax.random.normal(kw, (1, 1), dtype=jnp.float32)   # (out=1, in=1)
    bias = jax.random.normal(kb, (1,), dtype=jnp.float32)       # (out=1,)

    def reference(x):
        return jax.nn.sigmoid(x @ weight.T + bias)

    # 1) Tiny batch: remainder-only path (single (1, 128) block).
    x1 = jax.random.normal(k1, (8, 1), dtype=jnp.float32)
    y1 = logistic_forward(x1, weight, bias)
    jax.block_until_ready(y1)
    assert y1.shape == x1.shape
    assert jnp.allclose(y1, reference(x1), atol=1e-6), "mismatch vs reference (tiny batch)"

    # 2) Lane-aligned batch: fully zero-copy single-pallas_call path (N % 512 == 0).
    x2 = jax.random.normal(k2, (2048, 1), dtype=jnp.float32)
    y2 = logistic_forward(x2, weight, bias)
    jax.block_until_ready(y2)
    assert y2.shape == x2.shape
    assert jnp.allclose(y2, reference(x2), atol=1e-6), "mismatch vs reference (aligned batch)"

    # 3) Ragged batch with a small row_tile override: exercises the multi-step
    #    cdiv grid (masked edge block) plus the remainder path.
    x3 = jax.random.normal(k3, (5000, 1), dtype=jnp.float32)
    y3 = logistic_forward(x3, weight, bias, row_tile=8)
    jax.block_until_ready(y3)
    assert y3.shape == x3.shape
    assert jnp.allclose(y3, reference(x3), atol=1e-6), "mismatch vs reference (ragged batch)"

    print("KERNEL_OK")
</pallas_src>

<mosaic_0001>
module attributes {stable_mosaic.version = 11 : i64} {
  func.func @_logistic_kernel(%arg0: i32, %arg1: memref<1x1xf32, #tpu.memory_space<smem>>, %arg2: memref<1x1xf32, #tpu.memory_space<smem>>, %arg3: memref<1x128xf32, #tpu.memory_space<vmem>>, %arg4: memref<1x128xf32, #tpu.memory_space<vmem>>) attributes {dimension_semantics = [#tpu.dimension_semantics<parallel>], iteration_bounds = array<i64: 1>, scalar_prefetch = 0 : i64, scratch_operands = 0 : i64, tpu.core_type = #tpu.core_type<tc>, window_params = [{transform_indices = @transform_0, window_bounds = array<i64: 1, 1>}, {transform_indices = @transform_1, window_bounds = array<i64: 1, 1>}, {transform_indices = @transform_2, window_bounds = array<i64: 1, 128>}, {transform_indices = @transform_3, window_bounds = array<i64: 1, 128>}]} {
    %c0 = arith.constant 0 : index
    %c0_0 = arith.constant 0 : index
    %0 = memref.load %arg1[%c0, %c0_0] : memref<1x1xf32, #tpu.memory_space<smem>>
    %c0_1 = arith.constant 0 : index
    %c0_2 = arith.constant 0 : index
    %1 = memref.load %arg2[%c0_1, %c0_2] : memref<1x1xf32, #tpu.memory_space<smem>>
    %c0_3 = arith.constant 0 : index
    %c0_4 = arith.constant 0 : index
    %2 = vector.load %arg3[%c0_3, %c0_4] : memref<1x128xf32, #tpu.memory_space<vmem>>, vector<1x128xf32>
    %3 = vector.broadcast %0 : f32 to vector<1x128xf32>
    %4 = arith.mulf %2, %3 : vector<1x128xf32>
    %5 = vector.broadcast %1 : f32 to vector<1x128xf32>
    %6 = arith.addf %4, %5 : vector<1x128xf32>
    %cst = arith.constant 0.000000e+00 : f32
    %7 = vector.broadcast %cst : f32 to vector<1x128xf32>
    %8 = arith.subf %7, %6 : vector<1x128xf32>
    %9 = math.exp %8 : vector<1x128xf32>
    %cst_5 = arith.constant 1.000000e+00 : f32
    %10 = vector.broadcast %cst_5 : f32 to vector<1x128xf32>
    %11 = arith.addf %10, %9 : vector<1x128xf32>
    %cst_6 = arith.constant 1.000000e+00 : f32
    %12 = vector.broadcast %cst_6 : f32 to vector<1x128xf32>
    %13 = arith.divf %12, %11 : vector<1x128xf32>
    %c0_7 = arith.constant 0 : index
    %c0_8 = arith.constant 0 : index
    %14 = vector.load %arg4[%c0_7, %c0_8] : memref<1x128xf32, #tpu.memory_space<vmem>>, vector<1x128xf32>
    tpu.vector_store %arg4[%c0_7, %c0_8], %13 {strides = array<i32>} : memref<1x128xf32, #tpu.memory_space<vmem>>, vector<1x128xf32>,
    return
  }
  func.func @transform_0(%arg0: i32) -> (i32, i32) {
    %c0_i32 = arith.constant 0 : i32
    %c0_i32_0 = arith.constant 0 : i32
    %c0_i32_1 = arith.constant 0 : i32
    return %c0_i32, %c0_i32_0 : i32, i32
  }
  func.func @transform_1(%arg0: i32) -> (i32, i32) {
    %c0_i32 = arith.constant 0 : i32
    %c0_i32_0 = arith.constant 0 : i32
    %c0_i32_1 = arith.constant 0 : i32
    return %c0_i32, %c0_i32_0 : i32, i32
  }
  func.func @transform_2(%arg0: i32) -> (i32, i32) {
    %c0_i32 = arith.constant 0 : i32
    %c0_i32_0 = arith.constant 0 : i32
    return %arg0, %c0_i32 : i32, i32
  }
  func.func @transform_3(%arg0: i32) -> (i32, i32) {
    %c0_i32 = arith.constant 0 : i32
    %c0_i32_0 = arith.constant 0 : i32
    return %arg0, %c0_i32 : i32, i32
  }
}

</mosaic_0001>

<bundles_post_ra>
// kernel: tpu_custom_call.1
= control target key start
LH: loop header
LB: loop body
LE: loop exit
PB: predicated region body
PF: predicated region fallthrough
CT: control target
= control target key end

     0   :  { %s116_s0 = inlined_call_operand.<no memory space> [shape: f32[1,1], index: 0, kind: input, shape index: {}]   ;;  %s117_s1 = inlined_call_operand.<no memory space> [shape: f32[1,1], index: 1, kind: input, shape index: {}]   ;;  %s118_s2 = inlined_call_operand.vmem [shape: f32[1,128], index: 2, kind: input, shape index: {}]   ;;  %s119_s3 = inlined_call_operand.hbm [shape: f32[1,128], index: 3, kind: output, shape index: {}]  }
   0x1   :  { %v19_v0 = vld [vmem:[%s118_s2] sm:$0x1]  ;;  %v20_v1 = vstv %s116_s0  ;;  %v22_v2 = vstv %s117_s1 }
   0x2   :  { %10 = vsyncpa [#allocation5], 0  ;;  %v21_v3 = vmul.f32 %v20_v1, %v19_v0  ;;  %s74_s18 = smov [#allocation4]  }
   0x3   :  { %s37_s19 = sshll.u32 %s74_s18, 4  ;;  %s38_s19 = int_to_ptr.vmem [resolvable:$true] %s37_s19 }
   0x4   :  { %v23_v4 = vadd.f32 %v22_v2, %v21_v3  ;;  %s50_s2 = scalar_lea.vmem %s38_s19, 16  ;;  %s54_s0 = scalar_lea.vmem %s38_s19, 32 }
   0x5   :  { %p51_p0 = scmp.ne.s32.totalorder %s38_s19, %s50_s2  ;;  %p55_p1 = scmp.lt.s32.totalorder %s38_s19, %s38_s19 }
   0x6   :  { %v24_v5 = vsub.f32 0.0, %v23_v4  ;;  %p56_p2 = scmp.lt.s32.totalorder %s54_s0, %s50_s2 }
   0x8   :  { %v25_v6 = vmul.f32 1.442695, %v24_v5  ;;  %p57_p3 = por %p56_p2, %p55_p1 }
   0xa   :  { %46 = vpow2.f32 %v25_v6  ;;  %p58_p4 = pnand %p57_p3, %p51_p0 }
  0x14   :  { %v47_v7 = vpop.eup %46 }
  0x15   :  { %v27_v8 = vadd.f32 1.0, %v47_v7 }
  0x17   :  { %48 = vrcp.f32 %v27_v8 }
  0x21   :  { %v49_v9 = vpop.eup %48 }
  0x22   :  { %30 = vst [vmem:[#allocation4] sm:$0x1] %v49_v9 }
  0x23   :  { %61 = shalt.err (!%p58_p4)
}
  0x24   :  { %s62_s21 = scalar_lea.hbm %s119_s3, 16 }
  0x25   :  { %p63_p5 = scmp.ne.s32.totalorder %s119_s3, %s62_s21  ;;  %p66_p6 = scmp.lt.u32.totalorder %s62_s21, %s119_s3 }
  0x27   :  { %p68_p7 = pnand %p66_p6, %p63_p5 }
  0x29   :  { %71 = shalt.err (!%p68_p7)
}
  0x2a   :  { %40 = dma.vmem_to_hbm [thread:$0]  %s38_s19, 16, %s119_s3, [#allocation5]  }
  0x2b   :  { %72 = dma.done.wait [#allocation5], 16  }
  0x2c   :  { %73 = vsyncadd [#allocation5], 4294967280 }
  0x2d   :  { %44 = vsyncpa [#allocation5], 1 }

</bundles_post_ra>
